<compile_context>
chip_gen: v7x
topology: tpu7x:2x2x1
jax: 0.10.0
libtpu: 0.0.40
codegen_flags: <defaults>
</compile_context>

<pallas_src>
import functools

import jax
import jax.numpy as jnp
from jax.experimental import pallas as pl
from jax.experimental.pallas import tpu as pltpu


def _round_up(x: int, m: int) -> int:
    return ((x + m - 1) // m) * m


def _mxu_round(n: int) -> int:
    """Lane-align to 128; prefer 256-alignment (full-width v6e/v7x MXU passes)
    when the extra padding is a small fraction of the dim."""
    n128 = _round_up(n, 128)
    n256 = _round_up(n, 256)
    return n256 if (n256 - n128) * 8 <= n128 else n128


def _vmem_budget_bytes() -> int:
    try:
        cap = int(pltpu.get_tpu_info().vmem_capacity_bytes)
    except Exception:
        cap = 64 * 1024 * 1024  # conservative (v7x-sized) fallback
    return int(cap * 0.75)     # leave headroom for compiler scratch


def _ffn_resident_kernel(x_ref, w1_ref, b1_ref, w2_ref, b2_ref, o_ref):
    # Weights stay resident in VMEM (constant index_maps); one pass per row tile.
    h = jnp.dot(x_ref[...], w1_ref[...],
                preferred_element_type=jnp.float32) + b1_ref[...]
    h = jnp.maximum(h, 0.0)
    # TODO(synk): dropout omitted (identity in eval mode); for training build a
    #             keep-mask with pltpu.prng_seed + pltpu.prng_random_bits here.
    out = jnp.dot(h.astype(w2_ref.dtype), w2_ref[...],
                  preferred_element_type=jnp.float32) + b2_ref[...]
    o_ref[...] = out.astype(o_ref.dtype)


def _ffn_streamed_kernel(x_ref, w1_ref, b1_ref, w2_ref, b2_ref, o_ref, acc_ref):
    # pf_dim streams in chunks; second matmul accumulated in f32 VMEM scratch.
    j = pl.program_id(1)

    @pl.when(j == 0)
    def _():
        acc_ref[...] = jnp.zeros_like(acc_ref)

    h = jnp.dot(x_ref[...], w1_ref[...],
                preferred_element_type=jnp.float32) + b1_ref[...]
    h = jnp.maximum(h, 0.0)
    # TODO(synk): dropout omitted (identity in eval mode).
    acc_ref[...] += jnp.dot(h.astype(w2_ref.dtype), w2_ref[...],
                            preferred_element_type=jnp.float32)

    @pl.when(j == pl.num_programs(1) - 1)
    def _():
        o_ref[...] = (acc_ref[...] + b2_ref[...]).astype(o_ref.dtype)


@functools.partial(jax.jit, static_argnames=("tm", "tp"))
def positionwise_ffn(x, w1, b1, w2, b2, *, tm=None, tp=None):
    """x: [B, S, H]; w1: [H, P]; b1: [P]; w2: [P, H]; b2: [H] -> [B, S, H].

    Weights are stored as [in, out] (transposed PyTorch nn.Linear weight).
    Dropout is identity (eval/inference mode).  tm/tp=None -> auto-tuned from
    the device's VMEM capacity; passing tp forces the streamed path.
    """
    B, S, H = x.shape
    Hin, P = w1.shape
    assert Hin == H and w2.shape == (P, H) and b1.shape == (P,) and b2.shape == (H,)
    M = B * S

    out_dtype = x.dtype
    cdt = w1.dtype  # compute dtype fed to the MXU (use bf16 weights for serving)
    itemsize = jnp.dtype(cdt).itemsize
    out_itemsize = jnp.dtype(out_dtype).itemsize

    # Sub-32-bit dtypes pack along sublanes: align row tiles accordingly.
    row_align = {4: 8, 2: 16, 1: 32}.get(itemsize, 8)

    Hp = _mxu_round(H)
    Pp = _mxu_round(P)

    budget = _vmem_budget_bytes()

    # ---- Tile selection (trace-time Python on static shapes) ---------------
    def shrink_rows(t):
        return max(row_align, _round_up(t // 2, row_align))

    tm_sel = min(tm if tm is not None else 1024, _round_up(M, row_align))
    # v7x megacore: make sure the "parallel" row axis has >= 2 tiles.
    while M > row_align and _round_up(M, tm_sel) // tm_sel < 2 and tm_sel > row_align:
        tm_sel = shrink_rows(tm_sel)

    bias_bytes = 2 * 2 * (Pp + Hp) * 4                # f32 biases, x2 buffered (tiny)
    weight_bytes = 2 * 2 * Hp * Pp * itemsize          # W1+W2, conservatively x2

    def resident_bytes(tm_):
        return (weight_bytes + bias_bytes
                + 2 * tm_ * Hp * (itemsize + out_itemsize)   # x/out double-buffered
                + tm_ * Pp * (4 + itemsize))                 # h f32 + cast copy

    def streamed_bytes(tm_, tp_):
        return (2 * 2 * Hp * tp_ * itemsize + bias_bytes     # W1/W2 chunks, x2
                + 2 * tm_ * Hp * (itemsize + out_itemsize)   # x/out double-buffered
                + tm_ * Hp * 4                               # f32 accumulator
                + tm_ * tp_ * (4 + itemsize))                # h f32 + cast copy

    use_resident = tp is None and weight_bytes + bias_bytes <= int(budget * 0.6)
    if use_resident:
        t = tm_sel
        while resident_bytes(t) > budget and t > row_align:
            t = shrink_rows(t)
        use_resident = resident_bytes(t) <= budget
        if use_resident:
            tm_sel = t

    if not use_resident:
        tp_sel = _round_up(min(tp if tp is not None else 2048,
                               _round_up(P, 128)), 128)
        while streamed_bytes(tm_sel, tp_sel) > budget and tp_sel > 128:
            tp_sel = max(128, _round_up(tp_sel // 2, 128))
        while streamed_bytes(tm_sel, tp_sel) > budget and tm_sel > row_align:
            tm_sel = shrink_rows(tm_sel)
        Pp = _round_up(P, tp_sel)  # tp must divide the padded pf_dim

    Mp = _round_up(M, tm_sel)

    # ---- Padding (exact: zero rows/cols contribute nothing); skipped when
    # ---- already aligned, as is the astype when dtypes already match --------
    x2d = x.reshape(M, H)
    if x2d.dtype != cdt:
        x2d = x2d.astype(cdt)
    if (Mp, Hp) != (M, H):
        x2d = jnp.pad(x2d, ((0, Mp - M), (0, Hp - H)))

    w1p = w1 if w1.dtype == cdt else w1.astype(cdt)
    if (Hp, Pp) != (H, P):
        w1p = jnp.pad(w1p, ((0, Hp - H), (0, Pp - P)))
    w2p = w2 if w2.dtype == cdt else w2.astype(cdt)
    if (Pp, Hp) != (P, H):
        w2p = jnp.pad(w2p, ((0, Pp - P), (0, Hp - H)))

    b1p = b1.astype(jnp.float32)
    if Pp != P:
        b1p = jnp.pad(b1p, (0, Pp - P))
    b1p = b1p.reshape(1, Pp)
    b2p = b2.astype(jnp.float32)
    if Hp != H:
        b2p = jnp.pad(b2p, (0, Hp - H))
    b2p = b2p.reshape(1, Hp)

    n_row_tiles = Mp // tm_sel
    flops = 4 * M * H * P  # two matmuls, 2*M*H*P each
    weight_stream_factor = 1 if use_resident else n_row_tiles
    bytes_accessed = (Mp * Hp * itemsize + Mp * Hp * out_itemsize
                      + weight_stream_factor * 2 * Hp * Pp * itemsize
                      + (Pp + Hp) * 4)
    cost = pl.CostEstimate(flops=flops, transcendentals=0,
                           bytes_accessed=bytes_accessed)

    if use_resident:
        out = pl.pallas_call(
            _ffn_resident_kernel,
            out_shape=jax.ShapeDtypeStruct((Mp, Hp), out_dtype),
            grid_spec=pltpu.PrefetchScalarGridSpec(
                num_scalar_prefetch=0,
                grid=(n_row_tiles,),
                in_specs=[
                    pl.BlockSpec((tm_sel, Hp), lambda i: (i, 0)),  # x row tile
                    pl.BlockSpec((Hp, Pp), lambda i: (0, 0)),      # W1 (resident)
                    pl.BlockSpec((1, Pp), lambda i: (0, 0)),       # b1
                    pl.BlockSpec((Pp, Hp), lambda i: (0, 0)),      # W2 (resident)
                    pl.BlockSpec((1, Hp), lambda i: (0, 0)),       # b2
                ],
                out_specs=pl.BlockSpec((tm_sel, Hp), lambda i: (i, 0)),
            ),
            compiler_params=pltpu.CompilerParams(
                dimension_semantics=("parallel",),
                vmem_limit_bytes=budget),
            cost_estimate=cost,
        )(x2d, w1p, b1p, w2p, b2p)
    else:
        out = pl.pallas_call(
            _ffn_streamed_kernel,
            out_shape=jax.ShapeDtypeStruct((Mp, Hp), out_dtype),
            grid_spec=pltpu.PrefetchScalarGridSpec(
                num_scalar_prefetch=0,
                grid=(n_row_tiles, Pp // tp_sel),  # reduction axis last
                in_specs=[
                    pl.BlockSpec((tm_sel, Hp), lambda i, j: (i, 0)),  # x row tile
                    pl.BlockSpec((Hp, tp_sel), lambda i, j: (0, j)),  # W1 chunk
                    pl.BlockSpec((1, tp_sel), lambda i, j: (0, j)),   # b1 chunk
                    pl.BlockSpec((tp_sel, Hp), lambda i, j: (j, 0)),  # W2 chunk
                    pl.BlockSpec((1, Hp), lambda i, j: (0, 0)),       # b2
                ],
                out_specs=pl.BlockSpec((tm_sel, Hp), lambda i, j: (i, 0)),
                scratch_shapes=[pltpu.VMEM((tm_sel, Hp), jnp.float32)],
            ),
            compiler_params=pltpu.CompilerParams(
                dimension_semantics=("parallel", "arbitrary"),
                vmem_limit_bytes=budget),
            cost_estimate=cost,
        )(x2d, w1p, b1p, w2p, b2p)

    if (Mp, Hp) != (M, H):
        out = out[:M, :H]
    return out.reshape(B, S, H)


if __name__ == "__main__":
    # Small shapes consistent with the module: batch=2, seq=8, hid_dim=32, pf_dim=64.
    B, S, H, P = 2, 8, 32, 64

    key = jax.random.PRNGKey(0)
    kx, kw1, kb1, kw2, kb2 = jax.random.split(key, 5)

    x = jax.random.normal(kx, (B, S, H), dtype=jnp.float32)
    # Deterministic "Linear" params (stored as [in, out], i.e. W.T of PyTorch layout).
    w1 = jax.random.normal(kw1, (H, P), dtype=jnp.float32) * 0.1
    b1 = jax.random.normal(kb1, (P,), dtype=jnp.float32) * 0.1
    w2 = jax.random.normal(kw2, (P, H), dtype=jnp.float32) * 0.1
    b2 = jax.random.normal(kb2, (H,), dtype=jnp.float32) * 0.1

    # Pure-JAX reference (dropout is identity in eval mode).
    ref = jnp.maximum(x @ w1 + b1, 0.0) @ w2 + b2

    # Auto path (weights-resident for these sizes).
    out = positionwise_ffn(x, w1, b1, w2, b2)
    out = jax.block_until_ready(out)
    assert out.shape == (B, S, H)
    assert jnp.allclose(out, ref, atol=1e-5, rtol=1e-5)

    # Explicit tp forces the streamed / accumulating path; check it too.
    out2 = positionwise_ffn(x, w1, b1, w2, b2, tp=128)
    out2 = jax.block_until_ready(out2)
    assert jnp.allclose(out2, ref, atol=1e-5, rtol=1e-5)

    print("KERNEL_OK")
</pallas_src>

<mosaic_0001>
module attributes {stable_mosaic.version = 11 : i64} {
  func.func @_ffn_resident_kernel(%arg0: i32, %arg1: memref<8x128xf32, #tpu.memory_space<vmem>>, %arg2: memref<128x128xf32, #tpu.memory_space<vmem>>, %arg3: memref<1x128xf32, #tpu.memory_space<vmem>>, %arg4: memref<128x128xf32, #tpu.memory_space<vmem>>, %arg5: memref<1x128xf32, #tpu.memory_space<vmem>>, %arg6: memref<8x128xf32, #tpu.memory_space<vmem>>) attributes {dimension_semantics = [#tpu.dimension_semantics<parallel>], iteration_bounds = array<i64: 2>, scalar_prefetch = 0 : i64, scratch_operands = 0 : i64, tpu.core_type = #tpu.core_type<tc>, window_params = [{transform_indices = @transform_0, window_bounds = array<i64: 8, 128>}, {pipeline_mode = #tpu.pipeline_mode<synchronous>, transform_indices = @transform_1, window_bounds = array<i64: 128, 128>}, {pipeline_mode = #tpu.pipeline_mode<synchronous>, transform_indices = @transform_2, window_bounds = array<i64: 1, 128>}, {pipeline_mode = #tpu.pipeline_mode<synchronous>, transform_indices = @transform_3, window_bounds = array<i64: 128, 128>}, {pipeline_mode = #tpu.pipeline_mode<synchronous>, transform_indices = @transform_4, window_bounds = array<i64: 1, 128>}, {transform_indices = @transform_5, window_bounds = array<i64: 8, 128>}]} {
    %c0 = arith.constant 0 : index
    %c0_0 = arith.constant 0 : index
    %0 = vector.load %arg1[%c0, %c0_0] : memref<8x128xf32, #tpu.memory_space<vmem>>, vector<8x128xf32>
    %c0_1 = arith.constant 0 : index
    %c0_2 = arith.constant 0 : index
    %1 = vector.load %arg2[%c0_1, %c0_2] : memref<128x128xf32, #tpu.memory_space<vmem>>, vector<128x128xf32>
    %cst = arith.constant dense<0.000000e+00> : vector<8x128xf32>
    %2 = tpu.matmul %0, %1, %cst {dimension_numbers = #tpu.dot_dimension_numbers<[1], [0], [0], [1], [0, 0, 1, 1], [], []>} : vector<8x128xf32>, vector<128x128xf32>, vector<8x128xf32> -> vector<8x128xf32>
    %c0_3 = arith.constant 0 : index
    %c0_4 = arith.constant 0 : index
    %3 = vector.load %arg3[%c0_3, %c0_4] : memref<1x128xf32, #tpu.memory_space<vmem>>, vector<1x128xf32>
    %4 = vector.broadcast %3 : vector<1x128xf32> to vector<8x128xf32>
    %5 = arith.addf %2, %4 : vector<8x128xf32>
    %cst_5 = arith.constant 0.000000e+00 : f32
    %6 = vector.broadcast %cst_5 : f32 to vector<8x128xf32>
    %7 = arith.maximumf %5, %6 : vector<8x128xf32>
    %c0_6 = arith.constant 0 : index
    %c0_7 = arith.constant 0 : index
    %8 = vector.load %arg4[%c0_6, %c0_7] : memref<128x128xf32, #tpu.memory_space<vmem>>, vector<128x128xf32>
    %cst_8 = arith.constant dense<0.000000e+00> : vector<8x128xf32>
    %9 = tpu.matmul %7, %8, %cst_8 {dimension_numbers = #tpu.dot_dimension_numbers<[1], [0], [0], [1], [0, 0, 1, 1], [], []>} : vector<8x128xf32>, vector<128x128xf32>, vector<8x128xf32> -> vector<8x128xf32>
    %c0_9 = arith.constant 0 : index
    %c0_10 = arith.constant 0 : index
    %10 = vector.load %arg5[%c0_9, %c0_10] : memref<1x128xf32, #tpu.memory_space<vmem>>, vector<1x128xf32>
    %11 = vector.broadcast %10 : vector<1x128xf32> to vector<8x128xf32>
    %12 = arith.addf %9, %11 : vector<8x128xf32>
    %c0_11 = arith.constant 0 : index
    %c0_12 = arith.constant 0 : index
    %13 = vector.load %arg6[%c0_11, %c0_12] : memref<8x128xf32, #tpu.memory_space<vmem>>, vector<8x128xf32>
    tpu.vector_store %arg6[%c0_11, %c0_12], %12 {strides = array<i32>} : memref<8x128xf32, #tpu.memory_space<vmem>>, vector<8x128xf32>,
    return
  }
  func.func @transform_0(%arg0: i32) -> (i32, i32) {
    %c0_i32 = arith.constant 0 : i32
    %c0_i32_0 = arith.constant 0 : i32
    return %arg0, %c0_i32 : i32, i32
  }
  func.func @transform_1(%arg0: i32) -> (i32, i32) {
    %c0_i32 = arith.constant 0 : i32
    %c0_i32_0 = arith.constant 0 : i32
    %c0_i32_1 = arith.constant 0 : i32
    return %c0_i32, %c0_i32_0 : i32, i32
  }
  func.func @transform_2(%arg0: i32) -> (i32, i32) {
    %c0_i32 = arith.constant 0 : i32
    %c0_i32_0 = arith.constant 0 : i32
    %c0_i32_1 = arith.constant 0 : i32
    return %c0_i32, %c0_i32_0 : i32, i32
  }
  func.func @transform_3(%arg0: i32) -> (i32, i32) {
    %c0_i32 = arith.constant 0 : i32
    %c0_i32_0 = arith.constant 0 : i32
    %c0_i32_1 = arith.constant 0 : i32
    return %c0_i32, %c0_i32_0 : i32, i32
  }
  func.func @transform_4(%arg0: i32) -> (i32, i32) {
    %c0_i32 = arith.constant 0 : i32
    %c0_i32_0 = arith.constant 0 : i32
    %c0_i32_1 = arith.constant 0 : i32
    return %c0_i32, %c0_i32_0 : i32, i32
  }
  func.func @transform_5(%arg0: i32) -> (i32, i32) {
    %c0_i32 = arith.constant 0 : i32
    %c0_i32_0 = arith.constant 0 : i32
    return %arg0, %c0_i32 : i32, i32
  }
}

</mosaic_0001>

<bundles_post_ra>
// kernel: positionwise_ffn.1
= control target key start
LH: loop header
LB: loop body
LE: loop exit
PB: predicated region body
PF: predicated region fallthrough
CT: control target
= control target key end

     0   :  { %s677_s18 = smov 0   ;;  %s819_s0 = inlined_call_operand.vmem [shape: f32[16,128], index: 0, kind: input, shape index: {}]   ;;  %s820_s1 = inlined_call_operand.vmem [shape: f32[128,128], index: 1, kind: input, shape index: {}]   ;;  %s821_s2 = inlined_call_operand.vmem [shape: f32[1,128], index: 2, kind: input, shape index: {}]   ;;  %s822_s3 = inlined_call_operand.vmem [shape: f32[128,128], index: 3, kind: input, shape index: {}]   ;;  %s823_s4 = inlined_call_operand.vmem [shape: f32[1,128], index: 4, kind: input, shape index: {}]   ;;  %s824_s5 = inlined_call_operand.vmem [shape: f32[16,128], index: 5, kind: output, shape index: {}]  }
   0x1 LB: > { %s462_s19 = sadd.s32 4294967295, %s642_s18   ;;  %p466_p0 = scmp.ge.s32.totalorder %s642_s18, 1  ;;  %s642_s18 = sphi %s677_s18, %s15_s18  }
   0x2   : > { %p186_p1 = scmp.lt.s32.totalorder %s642_s18, 3 }
   0x4   : > { %p187_p2 = pnand %p466_p0, %p186_p1 }
   0x5   : > { %v221_v0 = vld [vmem:[%s820_s1] sm:$0xff] (!%p187_p2)  ;;  %v222_v1 = vld [vmem:[%s820_s1 + $0x8] sm:$0xff] (!%p187_p2)  ;;  %v223_v2 = vld [vmem:[%s820_s1 + $0x10] sm:$0xff] (!%p187_p2)  ;;  %v644_v3 = vmov (!%p187_p2), 0.0|0.0   ;;  %vm645_vm0 = vmmov (!%p187_p2), 0   ;;  %v646_v6 = vmov (!%p187_p2), 0.0  }
   0x6   : > { %190 = sbr.rel (%p187_p2) target bundleno = 470 (0x1d6), region = 40  ;;  %577 = vmatprep.subr.bf16.mxu0 (!%p187_p2), %v644_v3  ;;  %v578_v4 = vpack.c.bf16 (!%p187_p2), %v222_v1, %v221_v0  ;;  %v224_v5 = vld [vmem:[%s820_s1 + $0x18] sm:$0xff] (!%p187_p2)  ;;  %539 = vmatprep.mubr.msk.f32.mxu0 (!%p187_p2), %vm645_vm0, %v646_v6  ;;  %v225_v8 = vld [vmem:[%s820_s1 + $0x20] sm:$0xff] (!%p187_p2)  ;;  %v226_v9 = vld [vmem:[%s820_s1 + $0x28] sm:$0xff] (!%p187_p2)  ;;  %p212_p3 = scmp.lt.s32.totalorder (!%p187_p2), %s462_s19, 1 }
   0x7   : > { %601 = vmatprep.subr.bf16.mxu1 (!%p187_p2), %v644_v3  ;;  %574 = vmatprep.mubr.msk.f32.mxu1 (!%p187_p2), %vm645_vm0, %v646_v6  ;;  %v581_v7 = vpack.c.bf16 (!%p187_p2), %v224_v5, %v223_v2  ;;  %v315_v10 = vld [vmem:[%s822_s3] sm:$0xff] (!%p187_p2)  ;;  %v316_v11 = vld [vmem:[%s822_s3 + $0x8] sm:$0xff] (!%p187_p2)  ;;  %v317_v13 = vld [vmem:[%s822_s3 + $0x10] sm:$0xff] (!%p187_p2)  ;;  %v584_v15 = vpack.c.bf16 (!%p187_p2), %v226_v9, %v225_v8 }
   0x8   : > { %579 = vmatpush3.bf16.msra.mxu0 (!%p187_p2), %v578_v4  ;;  %v602_v12 = vpack.c.bf16 (!%p187_p2), %v316_v11, %v315_v10  ;;  %v318_v14 = vld [vmem:[%s822_s3 + $0x18] sm:$0xff] (!%p187_p2)  ;;  %v227_v16 = vld [vmem:[%s820_s1 + $0x30] sm:$0xff] (!%p187_p2)  ;;  %v319_v19 = vld [vmem:[%s822_s3 + $0x20] sm:$0xff] (!%p187_p2) }
   0x9   : > { %580 = vmatprep.subr.bf16.mxu0 (!%p187_p2), %v644_v3  ;;  %v228_v17 = vld [vmem:[%s820_s1 + $0x38] sm:$0xff] (!%p187_p2)  ;;  %v605_v18 = vpack.c.bf16 (!%p187_p2), %v318_v14, %v317_v13  ;;  %v320_v20 = vld [vmem:[%s822_s3 + $0x28] sm:$0xff] (!%p187_p2)  ;;  %v229_v22 = vld [vmem:[%s820_s1 + $0x40] sm:$0xff] (!%p187_p2) }
   0xa   : > { %603 = vmatpush3.bf16.msra.mxu1 (!%p187_p2), %v602_v12  ;;  %v587_v21 = vpack.c.bf16 (!%p187_p2), %v228_v17, %v227_v16  ;;  %v230_v23 = vld [vmem:[%s820_s1 + $0x48] sm:$0xff] (!%p187_p2)  ;;  %v608_v24 = vpack.c.bf16 (!%p187_p2), %v320_v20, %v319_v19  ;;  %v321_v25 = vld [vmem:[%s822_s3 + $0x30] sm:$0xff] (!%p187_p2)  ;;  %v322_v26 = vld [vmem:[%s822_s3 + $0x38] sm:$0xff] (!%p187_p2) }
   0xb   : > { %604 = vmatprep.subr.bf16.mxu1 (!%p187_p2), %v644_v3  ;;  %v590_v27 = vpack.c.bf16 (!%p187_p2), %v230_v23, %v229_v22  ;;  %v231_v28 = vld [vmem:[%s820_s1 + $0x50] sm:$0xff] (!%p187_p2)  ;;  %v232_v29 = vld [vmem:[%s820_s1 + $0x58] sm:$0xff] (!%p187_p2)  ;;  %v611_v30 = vpack.c.bf16 (!%p187_p2), %v322_v26, %v321_v25  ;;  %v323_v31 = vld [vmem:[%s822_s3 + $0x40] sm:$0xff] (!%p187_p2) }
   0xc   : > { %582 = vmatpush3.bf16.msra.mxu0 (!%p187_p2), %v581_v7  ;;  %v324_v32 = vld [vmem:[%s822_s3 + $0x48] sm:$0xff] (!%p187_p2)  ;;  %v593_v33 = vpack.c.bf16 (!%p187_p2), %v232_v29, %v231_v28  ;;  %v233_v34 = vld [vmem:[%s820_s1 + $0x60] sm:$0xff] (!%p187_p2)  ;;  %v325_v37 = vld [vmem:[%s822_s3 + $0x50] sm:$0xff] (!%p187_p2) }
   0xd   : > { %583 = vmatprep.subr.bf16.mxu0 %v644_v3  ;;  %v234_v35 = vld [vmem:[%s820_s1 + $0x68] sm:$0xff]  ;;  %v614_v36 = vpack.c.bf16 %v324_v32, %v323_v31  ;;  %s826_s19 = smov (!%p212_p3, %s462_s19), 1  ;;  %v326_v38 = vld [vmem:[%s822_s3 + $0x58] sm:$0xff]  ;;  %v235_v40 = vld [vmem:[%s820_s1 + $0x70] sm:$0xff] }
   0xe   : > { %606 = vmatpush3.bf16.msra.mxu1 %v605_v18  ;;  %v596_v39 = vpack.c.bf16 %v234_v35, %v233_v34  ;;  %v236_v41 = vld [vmem:[%s820_s1 + $0x78] sm:$0xff]  ;;  %v617_v42 = vpack.c.bf16 %v326_v38, %v325_v37  ;;  %s467_s30 = sshll.u32 %s826_s19, 3  ;;  %v327_v43 = vld [vmem:[%s822_s3 + $0x60] sm:$0xff]  ;;  %v328_v44 = vld [vmem:[%s822_s3 + $0x68] sm:$0xff] }
   0xf   : > { %607 = vmatprep.subr.bf16.mxu1 %v644_v3  ;;  %v599_v45 = vpack.c.bf16 %v236_v41, %v235_v40  ;;  %s215_s12 = scalar_lea.vmem %s819_s0, %s467_s30  ;;  %v620_v46 = vpack.c.bf16 %v328_v44, %v327_v43  ;;  %v329_v48 = vld [vmem:[%s822_s3 + $0x70] sm:$0xff]  ;;  %v330_v49 = vld [vmem:[%s822_s3 + $0x78] sm:$0xff]  ;;  %v469_v51 = vld [vmem:[%s821_s2] ss:$0 sm:$0xff]  ;;  %s219_s24 = scalar_lea.vmem %s824_s5, %s467_s30 }
  0x10   : > { %585 = vmatpush3.bf16.msra.mxu0 %v584_v15  ;;  %v220_v47 = vld [vmem:[%s215_s12] sm:$0xff]  ;;  %v623_v50 = vpack.c.bf16 %v330_v49, %v329_v48 }
  0x11   : > { %586 = vmatprep.subr.bf16.mxu0 %v644_v3  ;;  %v470_v56 = vld [vmem:[%s823_s4] ss:$0 sm:$0xff] }
  0x12   : > { %609 = vmatpush3.bf16.msra.mxu1 %v608_v24 }
  0x13   : > { %610 = vmatprep.subr.bf16.mxu1 %v644_v3 }
  0x14   : > { %588 = vmatpush3.bf16.msra.mxu0 %v587_v21 }
  0x15   : > { %589 = vmatprep.subr.bf16.mxu0 %v644_v3 }
  0x16   : > { %612 = vmatpush3.bf16.msra.mxu1 %v611_v30 }
  0x17   : > { %613 = vmatprep.subr.bf16.mxu1 %v644_v3 }
  0x18   : > { %591 = vmatpush3.bf16.msra.mxu0 %v590_v27 }
  0x19   : > { %592 = vmatprep.subr.bf16.mxu0 %v644_v3 }
  0x1a   : > { %615 = vmatpush3.bf16.msra.mxu1 %v614_v36 }
  0x1b   : > { %616 = vmatprep.subr.bf16.mxu1 %v644_v3 }
  0x1c   : > { %594 = vmatpush3.bf16.msra.mxu0 %v593_v33 }
  0x1d   : > { %595 = vmatprep.subr.bf16.mxu0 %v644_v3 }
  0x1e   : > { %618 = vmatpush3.bf16.msra.mxu1 %v617_v42 }
  0x1f   : > { %619 = vmatprep.subr.bf16.mxu1 %v644_v3 }
  0x20   : > { %597 = vmatpush3.bf16.msra.mxu0 %v596_v39 }
  0x21   : > { %598 = vmatprep.subr.bf16.mxu0 %v644_v3 }
  0x22   : > { %621 = vmatpush3.bf16.msra.mxu1 %v620_v46 }
  0x23   : > { %622 = vmatprep.subr.bf16.mxu1 %v644_v3 }
  0x24   : > { %600 = vmatpush3.bf16.msra.mxu0 %v599_v45 }
  0x26   : > { %624 = vmatpush3.bf16.msra.mxu1 %v623_v50 }
  0x27   : > { %540 = vmatmul.mubr.f32.vlgmr.msra.gmra.mrb[0].mxu0 %v220_v47 }
  0xfa   : > { %v310_v52 = vpop.f32.mrb[0].mxu0 }
  0xfb   : > { %v311_v53 = vadd.f32 %v469_v51, %v310_v52  ;;  %v541_v54 = vpop.f32.mrb[1].mxu0 }
  0xfd   : > { %v314_v55 = vmax.f32 %v311_v53, 0.0 }
  0xff   : > { %575 = vmatmul.mubr.f32.vlgmr.msra.gmra.mrb[0].mxu1 %v314_v55 }
 0x1d2   : > { %v404_v57 = vpop.f32.mrb[0].mxu1 }
 0x1d3   : > { %v405_v58 = vadd.f32 %v470_v56, %v404_v57  ;;  %v576_v59 = vpop.f32.mrb[1].mxu1 }
 0x1d5   : > { %408 = vst [vmem:[%s219_s24] sm:$0xff] %v405_v58 }
 0x1d6 PF: > { %s15_s18 = sadd.s32 1, %s642_s18  }
 0x1d7   : > { %p12_p4 = scmp.ge.s32.totalorder %s15_s18, 4  }
 0x1d9   :  { %14 = sbr.rel (!%p12_p4) target bundleno = 1 (0x1), region = 70 }

</bundles_post_ra>
